<compile_context>
chip_gen: v7x
topology: tpu7x:2x2x1
jax: 0.10.0
libtpu: 0.0.40
codegen_flags: <defaults>
</compile_context>

<pallas_src>
import functools
import math

import jax
import jax.numpy as jnp
from jax.experimental import pallas as pl
from jax.experimental.pallas import tpu as pltpu

_LANES = 128


def _pick_rows_tile(num_rows, lane_width, itemsize, n_arrays):
    """Rows per grid step: MiB-scale but VMEM-safe, multiple of 8 sublanes."""
    budget = max(512 * 1024, (4 << 20) // max(1, n_arrays))
    rows = max(8, budget // (lane_width * itemsize))
    if rows >= num_rows:
        return num_rows                     # block == full dim is always legal
    return max(8, (rows // 8) * 8)


def _hflip_packed_kernel(*refs, w):
    """Reverse within every w-lane group of the 128-lane axis (w power of 2).

    Butterfly: for h = w/2 .. 1, out[l] = x[l ^ h]; composed => x[l ^ (w-1)],
    i.e. a reversal inside each aligned w-lane group. Rolls run on the XLU,
    selects on the VPU; wrapped-around roll values are never selected.
    """
    n = len(refs) // 2
    x_refs, o_refs = refs[:n], refs[n:]
    rows, lanes = x_refs[0].shape
    lane = jax.lax.broadcasted_iota(jnp.int32, (rows, lanes), 1)
    for x_ref, o_ref in zip(x_refs, o_refs):
        x = x_ref[...]
        h = w // 2
        while h >= 1:
            fwd = pltpu.roll(x, lanes - h, axis=1)   # fwd[l] = x[(l + h) % lanes]
            bwd = pltpu.roll(x, h, axis=1)           # bwd[l] = x[(l - h) % lanes]
            x = jnp.where((lane & h) == 0, fwd, bwd)
            h //= 2
        o_ref[...] = x


def _hflip_group_packed(flats):
    """Flip a list of identically-shaped (rows, W) arrays; W power of 2 <= 128."""
    n = len(flats)
    r, w = flats[0].shape
    dtype = flats[0].dtype
    g = _LANES // w                       # rows packed per 128-lane vector
    rp = pl.cdiv(r, g) * g
    r2 = rp // g
    xs = []
    for f in flats:
        if rp != r:
            f = jnp.pad(f, ((0, rp - r), (0, 0)))
        xs.append(f.reshape(r2, _LANES))  # lane-dense view: lane = g_idx*w + col

    rows_tile = _pick_rows_tile(r2, _LANES, dtype.itemsize, n)
    spec = pl.BlockSpec((rows_tile, _LANES), lambda i: (i, 0))
    outs = pl.pallas_call(
        functools.partial(_hflip_packed_kernel, w=w),
        out_shape=tuple(jax.ShapeDtypeStruct((r2, _LANES), dtype)
                        for _ in range(n)),
        grid=(pl.cdiv(r2, rows_tile),),
        in_specs=[spec] * n,
        out_specs=tuple([spec] * n),
        compiler_params=pltpu.CompilerParams(
            dimension_semantics=("parallel",)),     # v7x: shard rows over 2 TCs
    )(*xs)
    if not isinstance(outs, (tuple, list)):
        outs = (outs,)
    res = []
    for o in outs:
        o = o.reshape(rp, w)
        res.append(o[:r] if rp != r else o)
    return res


def _hflip_matmul_kernel(x_ref, p_ref, o_ref):
    x = x_ref[...].astype(jnp.float32)
    y = jnp.dot(x, p_ref[...], preferred_element_type=jnp.float32)
    o_ref[...] = y.astype(o_ref.dtype)


def _hflip_matmul(flat):
    """Fallback for non-power-of-two W: one MXU matmul with an exchange matrix."""
    r, w = flat.shape
    col = jnp.arange(w, dtype=jnp.int32)
    perm = (col[:, None] + col[None, :] == w - 1).astype(jnp.float32)
    rows_tile = _pick_rows_tile(r, w, flat.dtype.itemsize, 1)
    spec = pl.BlockSpec((rows_tile, w), lambda i: (i, 0))
    return pl.pallas_call(
        _hflip_matmul_kernel,
        out_shape=jax.ShapeDtypeStruct((r, w), flat.dtype),
        grid=(pl.cdiv(r, rows_tile),),
        in_specs=[spec, pl.BlockSpec((w, w), lambda i: (0, 0))],
        out_specs=spec,
        compiler_params=pltpu.CompilerParams(
            dimension_semantics=("parallel",)),
    )(flat, perm)


def _hflip_group(flats):
    """Flip a list of identically-shaped (rows, W) arrays along W."""
    _, w = flats[0].shape
    if w <= _LANES and (w & (w - 1)) == 0:
        return _hflip_group_packed(flats)
    # TODO(synk): very large W could additionally be W-tiled via the index_map
    # (coarse block reversal); the exchange-matmul is exact for 0/1 masks and
    # ordinary image data but routes floats through an f32 MXU matmul.
    return [_hflip_matmul(f) for f in flats]


def hflip_tree(tree):
    """Flip every array leaf of `tree` along its last axis (Pallas kernels)."""
    leaves, treedef = jax.tree_util.tree_flatten(tree)
    out = list(leaves)
    groups = {}
    for idx, leaf in enumerate(leaves):
        if leaf.ndim == 0 or leaf.size == 0 or leaf.shape[-1] == 1:
            continue                                # flip is a no-op
        rows = math.prod(leaf.shape[:-1])
        groups.setdefault((leaf.dtype.name, rows, leaf.shape[-1]), []).append(idx)
    for (_, rows, w), idxs in groups.items():
        flats = [out[i].reshape(rows, w) for i in idxs]
        flipped = _hflip_group(flats)
        for i, f in zip(idxs, flipped):
            out[i] = f.reshape(out[i].shape)
    return jax.tree_util.tree_unflatten(treedef, out)


class RandomHorizontalFlip:
    """JAX/Pallas port of the PyTorch RandomHorizontalFlip transform."""

    def __init__(self, p=0.5):
        self.p = p

    def __call__(self, key, pv_imgs, art_imgs, pv_mask=None, art_mask=None):
        # torch.rand(1) < p  ->  explicit-key uniform draw; decided with
        # lax.cond so the no-flip branch never runs the kernels.
        do_flip = jax.random.uniform(key, ()) < self.p
        args = (pv_imgs, art_imgs, pv_mask, art_mask)
        return jax.lax.cond(do_flip, hflip_tree, lambda t: t, args)


if __name__ == "__main__":
    key = jax.random.PRNGKey(0)
    k1, k2, k3, kflip = jax.random.split(key, 4)

    pv_imgs = jax.random.normal(k1, (2, 4, 16, 16), dtype=jnp.float32)
    art_imgs = jax.random.normal(k2, (2, 4, 16, 16), dtype=jnp.float32)
    pv_mask = (jax.random.uniform(k3, (2, 1, 16, 16)) > 0.5).astype(jnp.int32)
    art_mask = (1 - pv_mask).astype(jnp.int32)
    inputs = (pv_imgs, art_imgs, pv_mask, art_mask)

    # 1) The Pallas flip path itself (always exercised, regardless of the draw).
    flipped = jax.block_until_ready(hflip_tree(inputs))
    for got, src in zip(flipped, inputs):
        want = jnp.flip(src, axis=-1)
        assert got.shape == want.shape and got.dtype == want.dtype
        assert bool(jnp.all(got == want)), "pallas hflip mismatch"

    # 2) Full module semantics (random flip-or-not) vs a plain-JAX reference.
    transform = RandomHorizontalFlip(p=0.5)
    out = jax.block_until_ready(transform(kflip, *inputs))
    do_flip = bool(jax.random.uniform(kflip, ()) < 0.5)
    ref = (lambda x: jnp.flip(x, axis=-1)) if do_flip else (lambda x: x)
    for got, want in zip(out, map(ref, inputs)):
        assert got.shape == want.shape and got.dtype == want.dtype
        assert bool(jnp.all(got == want)), "transform mismatch vs reference"

    print("KERNEL_OK")
</pallas_src>

<mosaic_0001>
module attributes {stable_mosaic.version = 11 : i64} {
  func.func @_hflip_packed_kernel(%arg0: i32, %arg1: memref<16x128xf32, #tpu.memory_space<vmem>>, %arg2: memref<16x128xf32, #tpu.memory_space<vmem>>, %arg3: memref<16x128xf32, #tpu.memory_space<vmem>>, %arg4: memref<16x128xf32, #tpu.memory_space<vmem>>) attributes {dimension_semantics = [#tpu.dimension_semantics<parallel>], iteration_bounds = array<i64: 1>, scalar_prefetch = 0 : i64, scratch_operands = 0 : i64, tpu.core_type = #tpu.core_type<tc>, window_params = [{transform_indices = @transform_0, window_bounds = array<i64: 16, 128>}, {transform_indices = @transform_1, window_bounds = array<i64: 16, 128>}, {transform_indices = @transform_2, window_bounds = array<i64: 16, 128>}, {transform_indices = @transform_3, window_bounds = array<i64: 16, 128>}]} {
    %0 = tpu.iota {dimensions = array<i32: 1>} : vector<16x128xi32>
    %c0 = arith.constant 0 : index
    %c0_0 = arith.constant 0 : index
    %1 = vector.load %arg1[%c0, %c0_0] : memref<16x128xf32, #tpu.memory_space<vmem>>, vector<16x128xf32>
    %c120_i32 = arith.constant 120 : i32
    %2 = tpu.dynamic_rotate %1 by %c120_i32 dim 1 : vector<16x128xf32>, i32 -> vector<16x128xf32>
    %c8_i32 = arith.constant 8 : i32
    %3 = tpu.dynamic_rotate %1 by %c8_i32 dim 1 : vector<16x128xf32>, i32 -> vector<16x128xf32>
    %c8_i32_1 = arith.constant 8 : i32
    %4 = vector.broadcast %c8_i32_1 : i32 to vector<16x128xi32>
    %5 = arith.andi %0, %4 : vector<16x128xi32>
    %c0_i32 = arith.constant 0 : i32
    %6 = vector.broadcast %c0_i32 : i32 to vector<16x128xi32>
    %7 = arith.cmpi eq, %5, %6 : vector<16x128xi32>
    %8 = arith.select %7, %2, %3 : vector<16x128xi1>, vector<16x128xf32>
    %c124_i32 = arith.constant 124 : i32
    %9 = tpu.dynamic_rotate %8 by %c124_i32 dim 1 : vector<16x128xf32>, i32 -> vector<16x128xf32>
    %c4_i32 = arith.constant 4 : i32
    %10 = tpu.dynamic_rotate %8 by %c4_i32 dim 1 : vector<16x128xf32>, i32 -> vector<16x128xf32>
    %c4_i32_2 = arith.constant 4 : i32
    %11 = vector.broadcast %c4_i32_2 : i32 to vector<16x128xi32>
    %12 = arith.andi %0, %11 : vector<16x128xi32>
    %c0_i32_3 = arith.constant 0 : i32
    %13 = vector.broadcast %c0_i32_3 : i32 to vector<16x128xi32>
    %14 = arith.cmpi eq, %12, %13 : vector<16x128xi32>
    %15 = arith.select %14, %9, %10 : vector<16x128xi1>, vector<16x128xf32>
    %c126_i32 = arith.constant 126 : i32
    %16 = tpu.dynamic_rotate %15 by %c126_i32 dim 1 : vector<16x128xf32>, i32 -> vector<16x128xf32>
    %c2_i32 = arith.constant 2 : i32
    %17 = tpu.dynamic_rotate %15 by %c2_i32 dim 1 : vector<16x128xf32>, i32 -> vector<16x128xf32>
    %c2_i32_4 = arith.constant 2 : i32
    %18 = vector.broadcast %c2_i32_4 : i32 to vector<16x128xi32>
    %19 = arith.andi %0, %18 : vector<16x128xi32>
    %c0_i32_5 = arith.constant 0 : i32
    %20 = vector.broadcast %c0_i32_5 : i32 to vector<16x128xi32>
    %21 = arith.cmpi eq, %19, %20 : vector<16x128xi32>
    %22 = arith.select %21, %16, %17 : vector<16x128xi1>, vector<16x128xf32>
    %c127_i32 = arith.constant 127 : i32
    %23 = tpu.dynamic_rotate %22 by %c127_i32 dim 1 : vector<16x128xf32>, i32 -> vector<16x128xf32>
    %c1_i32 = arith.constant 1 : i32
    %24 = tpu.dynamic_rotate %22 by %c1_i32 dim 1 : vector<16x128xf32>, i32 -> vector<16x128xf32>
    %c1_i32_6 = arith.constant 1 : i32
    %25 = vector.broadcast %c1_i32_6 : i32 to vector<16x128xi32>
    %26 = arith.andi %0, %25 : vector<16x128xi32>
    %c0_i32_7 = arith.constant 0 : i32
    %27 = vector.broadcast %c0_i32_7 : i32 to vector<16x128xi32>
    %28 = arith.cmpi eq, %26, %27 : vector<16x128xi32>
    %29 = arith.select %28, %23, %24 : vector<16x128xi1>, vector<16x128xf32>
    %c0_8 = arith.constant 0 : index
    %c0_9 = arith.constant 0 : index
    %30 = vector.load %arg3[%c0_8, %c0_9] : memref<16x128xf32, #tpu.memory_space<vmem>>, vector<16x128xf32>
    tpu.vector_store %arg3[%c0_8, %c0_9], %29 {strides = array<i32>} : memref<16x128xf32, #tpu.memory_space<vmem>>, vector<16x128xf32>,
    %c0_10 = arith.constant 0 : index
    %c0_11 = arith.constant 0 : index
    %31 = vector.load %arg2[%c0_10, %c0_11] : memref<16x128xf32, #tpu.memory_space<vmem>>, vector<16x128xf32>
    %c120_i32_12 = arith.constant 120 : i32
    %32 = tpu.dynamic_rotate %31 by %c120_i32_12 dim 1 : vector<16x128xf32>, i32 -> vector<16x128xf32>
    %c8_i32_13 = arith.constant 8 : i32
    %33 = tpu.dynamic_rotate %31 by %c8_i32_13 dim 1 : vector<16x128xf32>, i32 -> vector<16x128xf32>
    %c8_i32_14 = arith.constant 8 : i32
    %34 = vector.broadcast %c8_i32_14 : i32 to vector<16x128xi32>
    %35 = arith.andi %0, %34 : vector<16x128xi32>
    %c0_i32_15 = arith.constant 0 : i32
    %36 = vector.broadcast %c0_i32_15 : i32 to vector<16x128xi32>
    %37 = arith.cmpi eq, %35, %36 : vector<16x128xi32>
    %38 = arith.select %37, %32, %33 : vector<16x128xi1>, vector<16x128xf32>
    %c124_i32_16 = arith.constant 124 : i32
    %39 = tpu.dynamic_rotate %38 by %c124_i32_16 dim 1 : vector<16x128xf32>, i32 -> vector<16x128xf32>
    %c4_i32_17 = arith.constant 4 : i32
    %40 = tpu.dynamic_rotate %38 by %c4_i32_17 dim 1 : vector<16x128xf32>, i32 -> vector<16x128xf32>
    %c4_i32_18 = arith.constant 4 : i32
    %41 = vector.broadcast %c4_i32_18 : i32 to vector<16x128xi32>
    %42 = arith.andi %0, %41 : vector<16x128xi32>
    %c0_i32_19 = arith.constant 0 : i32
    %43 = vector.broadcast %c0_i32_19 : i32 to vector<16x128xi32>
    %44 = arith.cmpi eq, %42, %43 : vector<16x128xi32>
    %45 = arith.select %44, %39, %40 : vector<16x128xi1>, vector<16x128xf32>
    %c126_i32_20 = arith.constant 126 : i32
    %46 = tpu.dynamic_rotate %45 by %c126_i32_20 dim 1 : vector<16x128xf32>, i32 -> vector<16x128xf32>
    %c2_i32_21 = arith.constant 2 : i32
    %47 = tpu.dynamic_rotate %45 by %c2_i32_21 dim 1 : vector<16x128xf32>, i32 -> vector<16x128xf32>
    %c2_i32_22 = arith.constant 2 : i32
    %48 = vector.broadcast %c2_i32_22 : i32 to vector<16x128xi32>
    %49 = arith.andi %0, %48 : vector<16x128xi32>
    %c0_i32_23 = arith.constant 0 : i32
    %50 = vector.broadcast %c0_i32_23 : i32 to vector<16x128xi32>
    %51 = arith.cmpi eq, %49, %50 : vector<16x128xi32>
    %52 = arith.select %51, %46, %47 : vector<16x128xi1>, vector<16x128xf32>
    %c127_i32_24 = arith.constant 127 : i32
    %53 = tpu.dynamic_rotate %52 by %c127_i32_24 dim 1 : vector<16x128xf32>, i32 -> vector<16x128xf32>
    %c1_i32_25 = arith.constant 1 : i32
    %54 = tpu.dynamic_rotate %52 by %c1_i32_25 dim 1 : vector<16x128xf32>, i32 -> vector<16x128xf32>
    %c1_i32_26 = arith.constant 1 : i32
    %55 = vector.broadcast %c1_i32_26 : i32 to vector<16x128xi32>
    %56 = arith.andi %0, %55 : vector<16x128xi32>
    %c0_i32_27 = arith.constant 0 : i32
    %57 = vector.broadcast %c0_i32_27 : i32 to vector<16x128xi32>
    %58 = arith.cmpi eq, %56, %57 : vector<16x128xi32>
    %59 = arith.select %58, %53, %54 : vector<16x128xi1>, vector<16x128xf32>
    %c0_28 = arith.constant 0 : index
    %c0_29 = arith.constant 0 : index
    %60 = vector.load %arg4[%c0_28, %c0_29] : memref<16x128xf32, #tpu.memory_space<vmem>>, vector<16x128xf32>
    tpu.vector_store %arg4[%c0_28, %c0_29], %59 {strides = array<i32>} : memref<16x128xf32, #tpu.memory_space<vmem>>, vector<16x128xf32>,
    return
  }
  func.func @transform_0(%arg0: i32) -> (i32, i32) {
    %c0_i32 = arith.constant 0 : i32
    %c0_i32_0 = arith.constant 0 : i32
    return %arg0, %c0_i32 : i32, i32
  }
  func.func @transform_1(%arg0: i32) -> (i32, i32) {
    %c0_i32 = arith.constant 0 : i32
    %c0_i32_0 = arith.constant 0 : i32
    return %arg0, %c0_i32 : i32, i32
  }
  func.func @transform_2(%arg0: i32) -> (i32, i32) {
    %c0_i32 = arith.constant 0 : i32
    %c0_i32_0 = arith.constant 0 : i32
    return %arg0, %c0_i32 : i32, i32
  }
  func.func @transform_3(%arg0: i32) -> (i32, i32) {
    %c0_i32 = arith.constant 0 : i32
    %c0_i32_0 = arith.constant 0 : i32
    return %arg0, %c0_i32 : i32, i32
  }
}

</mosaic_0001>

<bundles_post_ra>
// kernel: tpu_custom_call.1
= control target key start
LH: loop header
LB: loop body
LE: loop exit
PB: predicated region body
PF: predicated region fallthrough
CT: control target
= control target key end

     0   :  { %9 = vsyncpa [#allocation3], 0  ;;  %s435_s0 = inlined_call_operand.hbm [shape: f32[16,128], index: 0, kind: input, shape index: {}]   ;;  %s436_s1 = inlined_call_operand.hbm [shape: f32[16,128], index: 1, kind: input, shape index: {}]   ;;  %s437_s2 = inlined_call_operand.hbm [shape: f32[16,128], index: 2, kind: output, shape index: {0}]   ;;  %s438_s3 = inlined_call_operand.hbm [shape: f32[16,128], index: 3, kind: output, shape index: {1}]  }
   0x1   :  { %10 = vsyncpa [#allocation6], 0 }
   0x2   :  { %11 = vsyncpa [#allocation4], 0 }
   0x3   :  { %12 = vsyncpa [#allocation9], 0  ;;  %s284_s12 = smov [#allocation2]   ;;  %s188_s16 = scalar_lea.hbm %s435_s0, 256 }
   0x4   :  { %s18_s13 = sshll.u32 %s284_s12, 4  ;;  %p189_p0 = scmp.ne.s32.totalorder %s435_s0, %s188_s16  ;;  %s19_s13 = int_to_ptr.vmem [resolvable:$true] %s18_s13 }
   0x5   :  { %p192_p1 = scmp.lt.u32.totalorder %s188_s16, %s435_s0 }
   0x7   :  { %p194_p2 = pnand %p192_p1, %p189_p0 }
   0x9   :  { %197 = shalt.err (!%p194_p2)
}
   0xa   :  { %s198_s21 = scalar_lea.vmem %s19_s13, 256  ;;  %p203_p4 = scmp.lt.s32.totalorder %s19_s13, %s19_s13 }
   0xb   :  { %p199_p3 = scmp.ne.s32.totalorder %s19_s13, %s198_s21  ;;  %p204_p5 = scmp.lt.s32.totalorder %s198_s21, %s198_s21 }
   0xd   :  { %p205_p6 = por %p204_p5, %p203_p4 }
   0xf   :  { %p206_p7 = pnand %p205_p6, %p199_p3 }
  0x11   :  { %209 = shalt.err (!%p206_p7)
}
  0x12   :  { %s285_s22 = smov 128   ;;  %s286_s23 = smov 8  }
  0x13   :  { %24 = dma.hbm_to_vmem [thread:$0]  %s435_s0, 256, %s19_s13, [#allocation3], %s285_s22, %s285_s22, %s286_s23  }
  0x14   :  { %s287_s26 = smov [#allocation5]   ;;  %s210_s30 = scalar_lea.hbm %s436_s1, 256 }
  0x15   :  { %s30_s27 = sshll.u32 %s287_s26, 4  ;;  %p211_p8 = scmp.ne.s32.totalorder %s436_s1, %s210_s30  ;;  %s31_s27 = int_to_ptr.vmem [resolvable:$true] %s30_s27 }
  0x16   :  { %p214_p9 = scmp.lt.u32.totalorder %s210_s30, %s436_s1 }
  0x18   :  { %p216_p10 = pnand %p214_p9, %p211_p8 }
  0x1a   :  { %219 = shalt.err (!%p216_p10)
}
  0x1b   :  { %s220_s8 = scalar_lea.vmem %s31_s27, 256  ;;  %p225_p12 = scmp.lt.s32.totalorder %s31_s27, %s31_s27 }
  0x1c   :  { %p221_p11 = scmp.ne.s32.totalorder %s31_s27, %s220_s8  ;;  %p226_p13 = scmp.lt.s32.totalorder %s220_s8, %s220_s8 }
  0x1e   :  { %p227_p0 = por %p226_p13, %p225_p12 }
  0x20   :  { %p228_p1 = pnand %p227_p0, %p221_p11 }
  0x22   :  { %231 = shalt.err (!%p228_p1)
}
  0x23   :  { %36 = dma.hbm_to_vmem [thread:$0]  %s436_s1, 256, %s31_s27, [#allocation6], %s285_s22, %s285_s22, %s286_s23  }
  0x24   :  { %276 = dma.done.wait [#allocation3], 256  }
  0x25   :  { %277 = vsyncadd [#allocation3], 4294967040 }
  0x26   :  { %278 = dma.done.wait [#allocation6], 256  }
  0x27   :  { %279 = vsyncadd [#allocation6], 4294967040  ;;  %v45_v0 = vld [vmem:[#allocation2] sm:$0xff]  ;;  %s288_s10 = smov 120   ;;  %v46_v1 = vld [vmem:[#allocation2 + $0x8] sm:$0xff]  ;;  %v43_v4 = vlaneseq  ;;  %s289_s1 = smov 124  }
  0x28   :  { %51 = vrot.lane.b32.xlu1 %v45_v0, %s286_s23  ;;  %47 = vrot.lane.b32.xlu0 %v45_v0, %s288_s10  ;;  %v98_v2 = vld [vmem:[#allocation5 + $0x8] sm:$0xff]  ;;  %v97_v3 = vld [vmem:[#allocation5] sm:$0xff]  ;;  %s290_s11 = smov 4   ;;  %s291_s12 = smov 126  }
  0x29   :  { %v351_v5 = vand.u32 127, %v43_v4  ;;  %s292_s13 = smov 2   ;;  %s293_s14 = smov 127  }
  0x2a   :  { %s294_s15 = smov 1   ;;  %s295_s16 = smov [#allocation7]  }
  0x2b   :  { %v55_v6 = vand.u32 8, %v351_v5  ;;  %v67_v20 = vand.u32 4, %v351_v5  ;;  %v79_v34 = vand.u32 2, %v351_v5  ;;  %v91_v48 = vand.u32 1, %v351_v5  ;;  %s146_s17 = sshll.u32 %s295_s16, 4  ;;  %s147_s17 = int_to_ptr.vmem [resolvable:$true] %s146_s17 }
  0x2c   :  { %53 = vrot.lane.b32.xlu1 %v46_v1, %s286_s23  ;;  %49 = vrot.lane.b32.xlu0 %v46_v1, %s288_s10  ;;  %s232_s18 = scalar_lea.vmem %s147_s17, 256  ;;  %p237_p3 = scmp.lt.s32.totalorder %s147_s17, %s147_s17 }
  0x2d   :  { %vm354_vm0 = vcmp.eq.s32.totalorder %v55_v6, 0  ;;  %vm367_vm1 = vcmp.eq.s32.totalorder %v67_v20, 0  ;;  %vm380_vm2 = vcmp.eq.s32.totalorder %v79_v34, 0  ;;  %vm393_vm3 = vcmp.eq.s32.totalorder %v91_v48, 0  ;;  %p233_p2 = scmp.ne.s32.totalorder %s147_s17, %s232_s18  ;;  %p238_p4 = scmp.lt.s32.totalorder %s232_s18, %s232_s18 }
  0x2f   :  { %p239_p5 = por %p238_p4, %p237_p3 }
  0x30   :  { %101 = vrot.lane.b32.xlu1 %v98_v2, %s288_s10  ;;  %99 = vrot.lane.b32.xlu0 %v97_v3, %s288_s10 }
  0x31   :  { %p240_p6 = pnand %p239_p5, %p233_p2 }
  0x34   :  { %105 = vrot.lane.b32.xlu1 %v98_v2, %s286_s23  ;;  %103 = vrot.lane.b32.xlu0 %v97_v3, %s286_s23 }
  0x9a   :  { %v52_v8 = vpop.permute.xlu1 %51  ;;  %v48_v9 = vpop.permute.xlu0 %47 }
  0x9b   :  { %v57_v10 = vsel %vm354_vm0, %v48_v9, %v52_v8 }
  0x9c   :  { %59 = vrot.lane.b32.xlu0 %v57_v10, %s289_s1 }
  0x9e   :  { %v54_v11 = vpop.permute.xlu1 %53  ;;  %v50_v12 = vpop.permute.xlu0 %49 }
  0x9f   :  { %v58_v13 = vsel %vm354_vm0, %v50_v12, %v54_v11 }
  0xa0   :  { %63 = vrot.lane.b32.xlu0 %v57_v10, %s290_s11  ;;  %61 = vrot.lane.b32.xlu1 %v58_v13, %s289_s1 }
  0xa2   :  { %v102_v14 = vpop.permute.xlu1 %101  ;;  %v100_v15 = vpop.permute.xlu0 %99 }
  0xa4   :  { %65 = vrot.lane.b32.xlu1 %v58_v13, %s290_s11 }
  0xa6   :  { %v106_v16 = vpop.permute.xlu1 %105  ;;  %v104_v17 = vpop.permute.xlu0 %103 }
  0xa7   :  { %v108_v18 = vsel %vm354_vm0, %v102_v14, %v106_v16  ;;  %v107_v19 = vsel %vm354_vm0, %v100_v15, %v104_v17 }
  0xa8   :  { %111 = vrot.lane.b32.xlu1 %v108_v18, %s289_s1  ;;  %109 = vrot.lane.b32.xlu0 %v107_v19, %s289_s1 }
  0xac   :  { %115 = vrot.lane.b32.xlu1 %v108_v18, %s290_s11  ;;  %113 = vrot.lane.b32.xlu0 %v107_v19, %s290_s11 }
 0x10e   :  { %v60_v21 = vpop.permute.xlu0 %59 }
 0x112   :  { %v62_v23 = vpop.permute.xlu1 %61  ;;  %v64_v24 = vpop.permute.xlu0 %63 }
 0x113   :  { %v69_v25 = vsel %vm367_vm1, %v60_v21, %v64_v24 }
 0x114   :  { %71 = vrot.lane.b32.xlu0 %v69_v25, %s291_s12 }
 0x116   :  { %v66_v26 = vpop.permute.xlu1 %65 }
 0x117   :  { %v70_v27 = vsel %vm367_vm1, %v62_v23, %v66_v26 }
 0x118   :  { %73 = vrot.lane.b32.xlu1 %v70_v27, %s291_s12  ;;  %75 = vrot.lane.b32.xlu0 %v69_v25, %s292_s13 }
 0x11a   :  { %v112_v28 = vpop.permute.xlu1 %111  ;;  %v110_v29 = vpop.permute.xlu0 %109 }
 0x11c   :  { %77 = vrot.lane.b32.xlu1 %v70_v27, %s292_s13 }
 0x11e   :  { %v116_v30 = vpop.permute.xlu1 %115  ;;  %v114_v31 = vpop.permute.xlu0 %113 }
 0x11f   :  { %v118_v32 = vsel %vm367_vm1, %v112_v28, %v116_v30  ;;  %v117_v33 = vsel %vm367_vm1, %v110_v29, %v114_v31 }
 0x120   :  { %121 = vrot.lane.b32.xlu1 %v118_v32, %s291_s12  ;;  %119 = vrot.lane.b32.xlu0 %v117_v33, %s291_s12 }
 0x124   :  { %125 = vrot.lane.b32.xlu1 %v118_v32, %s292_s13  ;;  %123 = vrot.lane.b32.xlu0 %v117_v33, %s292_s13 }
 0x186   :  { %v72_v35 = vpop.permute.xlu0 %71 }
 0x18a   :  { %v74_v37 = vpop.permute.xlu1 %73  ;;  %v76_v38 = vpop.permute.xlu0 %75 }
 0x18b   :  { %v81_v39 = vsel %vm380_vm2, %v72_v35, %v76_v38 }
 0x18c   :  { %83 = vrot.lane.b32.xlu0 %v81_v39, %s293_s14 }
 0x18e   :  { %v78_v40 = vpop.permute.xlu1 %77 }
 0x18f   :  { %v82_v41 = vsel %vm380_vm2, %v74_v37, %v78_v40 }
 0x190   :  { %85 = vrot.lane.b32.xlu1 %v82_v41, %s293_s14  ;;  %87 = vrot.lane.b32.xlu0 %v81_v39, %s294_s15 }
 0x192   :  { %v122_v42 = vpop.permute.xlu1 %121  ;;  %v120_v43 = vpop.permute.xlu0 %119 }
 0x194   :  { %89 = vrot.lane.b32.xlu1 %v82_v41, %s294_s15 }
 0x196   :  { %v126_v44 = vpop.permute.xlu1 %125  ;;  %v124_v45 = vpop.permute.xlu0 %123 }
 0x197   :  { %v128_v46 = vsel %vm380_vm2, %v122_v42, %v126_v44  ;;  %v127_v47 = vsel %vm380_vm2, %v120_v43, %v124_v45 }
 0x198   :  { %131 = vrot.lane.b32.xlu1 %v128_v46, %s293_s14  ;;  %129 = vrot.lane.b32.xlu0 %v127_v47, %s293_s14 }
 0x19c   :  { %135 = vrot.lane.b32.xlu1 %v128_v46, %s294_s15  ;;  %133 = vrot.lane.b32.xlu0 %v127_v47, %s294_s15 }
 0x1fe   :  { %v84_v49 = vpop.permute.xlu0 %83 }
 0x202   :  { %v86_v51 = vpop.permute.xlu1 %85  ;;  %v88_v52 = vpop.permute.xlu0 %87 }
 0x203   :  { %v93_v53 = vsel %vm393_vm3, %v84_v49, %v88_v52 }
 0x204   :  { %95 = vst [vmem:[#allocation7] sm:$0xff] %v93_v53 }
 0x206   :  { %v90_v54 = vpop.permute.xlu1 %89 }
 0x207   :  { %v94_v55 = vsel %vm393_vm3, %v86_v51, %v90_v54 }
 0x208   :  { %96 = vst [vmem:[#allocation7 + $0x8] sm:$0xff] %v94_v55 }
 0x209   :  { %243 = shalt.err (!%p240_p6)
}
 0x20a   :  { %s244_s21 = scalar_lea.hbm %s437_s2, 256 }
 0x20b   :  { %p245_p7 = scmp.ne.s32.totalorder %s437_s2, %s244_s21  ;;  %p248_p8 = scmp.lt.u32.totalorder %s244_s21, %s437_s2 }
 0x20d   :  { %p250_p9 = pnand %p248_p8, %p245_p7 }
 0x20f   :  { %253 = shalt.err (!%p250_p9)
}
 0x210   :  { %152 = dma.vmem_to_hbm [thread:$0]  %s147_s17, 256, %s437_s2, [#allocation4], %s285_s22, %s285_s22, %s286_s23   ;;  %v132_v56 = vpop.permute.xlu1 %131  ;;  %v130_v57 = vpop.permute.xlu0 %129 }
 0x211   :  { %s296_s30 = smov [#allocation8]  }
 0x212   :  { %s158_s4 = sshll.u32 %s296_s30, 4  ;;  %s159_s4 = int_to_ptr.vmem [resolvable:$true] %s158_s4 }
 0x213   :  { %s254_s5 = scalar_lea.vmem %s159_s4, 256  ;;  %p259_p11 = scmp.lt.s32.totalorder %s159_s4, %s159_s4 }
 0x214   :  { %v136_v58 = vpop.permute.xlu1 %135  ;;  %v134_v59 = vpop.permute.xlu0 %133  ;;  %p255_p10 = scmp.ne.s32.totalorder %s159_s4, %s254_s5  ;;  %p260_p12 = scmp.lt.s32.totalorder %s254_s5, %s254_s5 }
 0x215   :  { %v138_v60 = vsel %vm393_vm3, %v132_v56, %v136_v58  ;;  %v137_v61 = vsel %vm393_vm3, %v130_v57, %v134_v59 }
 0x216   :  { %140 = vst [vmem:[#allocation8 + $0x8] sm:$0xff] %v138_v60  ;;  %139 = vst [vmem:[#allocation8] sm:$0xff] %v137_v61  ;;  %p261_p13 = por %p260_p12, %p259_p11 }
 0x218   :  { %p262_p0 = pnand %p261_p13, %p255_p10 }
 0x21a   :  { %265 = shalt.err (!%p262_p0)
}
 0x21b   :  { %s266_s7 = scalar_lea.hbm %s438_s3, 256 }
 0x21c   :  { %p267_p1 = scmp.ne.s32.totalorder %s438_s3, %s266_s7  ;;  %p270_p2 = scmp.lt.u32.totalorder %s266_s7, %s438_s3 }
 0x21e   :  { %p272_p3 = pnand %p270_p2, %p267_p1 }
 0x220   :  { %275 = shalt.err (!%p272_p3)
}
 0x221   :  { %164 = dma.vmem_to_hbm [thread:$0]  %s159_s4, 256, %s438_s3, [#allocation9], %s285_s22, %s285_s22, %s286_s23  }
 0x222   :  { %280 = dma.done.wait [#allocation4], 256  }
 0x223   :  { %281 = vsyncadd [#allocation4], 4294967040 }
 0x224   :  { %282 = dma.done.wait [#allocation9], 256  }
 0x225   :  { %283 = vsyncadd [#allocation9], 4294967040 }
 0x226   :  { %171 = vsyncpa [#allocation3], 1 }
 0x227   :  { %172 = vsyncpa [#allocation6], 1 }
 0x228   :  { %173 = vsyncpa [#allocation4], 1 }
 0x229   :  { %174 = vsyncpa [#allocation9], 1 }

</bundles_post_ra>
